<compile_context>
chip_gen: v6e
topology: v6e:2x2x1
jax: 0.10.0
libtpu: 0.0.40
codegen_flags: <defaults>
</compile_context>

<pallas_src>
import functools

import jax
import jax.numpy as jnp
from jax.experimental import pallas as pl
from jax.experimental.pallas import tpu as pltpu


def _round_up(n, m):
    return ((n + m - 1) // m) * m


def linear_relu_kernel(x_ref, w_ref, b_ref, o_ref):
    # x_ref: (tb, IN), w_ref: (IN, OUT), b_ref: (1, OUT), o_ref: (tb, OUT)
    y = jnp.dot(x_ref[...], w_ref[...], preferred_element_type=jnp.float32)
    y = y + b_ref[...]
    o_ref[...] = jnp.maximum(y, 0.0).astype(o_ref.dtype)


@functools.partial(jax.jit, static_argnames=("tile_b",))
def net_forward(x, w_t, b, *, tile_b=4096):
    """Pallas equivalent of Net.forward: relu(x @ W^T + b).

    x:   (B, 16)  float32
    w_t: (16, 10) float32   (transposed PyTorch Linear weight)
    b:   (1, 10)  float32
    returns (B, 10) float32
    """
    B, IN = x.shape
    OUT = w_t.shape[1]

    # --- batch tile selection ---
    # f32 sublane group is 8; a block second-to-last dim must be a multiple of 8
    # or equal the full dim.  For large B, cap the tile so the grid has >= ~8
    # steps (shards across v7x's 2 TensorCores, keeps the pipeline full); never
    # exceed tile_b (per-step VMEM stays tiny: tb*64 B in + tb*40 B out, 2x buf).
    if B <= 8:
        tb = B                                        # full-dim block, always legal
    else:
        target = _round_up(pl.cdiv(B, 8), 8)          # ~B/8 rows per step
        tb = max(8, min(tile_b, target))

    grid = (pl.cdiv(B, tb),)                          # ragged last block edge-clipped

    cost = pl.CostEstimate(
        flops=2 * B * IN * OUT,
        transcendentals=0,
        bytes_accessed=(B * IN + IN * OUT + OUT + B * OUT) * 4,
    )

    return pl.pallas_call(
        linear_relu_kernel,
        out_shape=jax.ShapeDtypeStruct((B, OUT), jnp.float32),
        grid_spec=pltpu.PrefetchScalarGridSpec(
            num_scalar_prefetch=0,
            grid=grid,
            in_specs=[
                pl.BlockSpec((tb, IN), lambda i: (i, 0)),     # x tile (pipelined)
                pl.BlockSpec((IN, OUT), lambda i: (0, 0)),    # weight (resident)
                pl.BlockSpec((1, OUT), lambda i: (0, 0)),     # bias   (resident)
            ],
            out_specs=pl.BlockSpec((tb, OUT), lambda i: (i, 0)),  # unpadded writeback
        ),
        compiler_params=pltpu.CompilerParams(
            dimension_semantics=("parallel",),  # shards B across TCs on v7x
        ),
        cost_estimate=cost,
    )(x, w_t, b)


if __name__ == "__main__":
    key = jax.random.PRNGKey(0)
    k_x, k_w, k_b = jax.random.split(key, 3)

    # Small shapes consistent with the module: Linear(16 -> 10).
    B, IN, OUT = 8, 16, 10
    x = jax.random.normal(k_x, (B, IN), dtype=jnp.float32)
    # weights_init: weight ~ N(0, 0.1); bias keeps PyTorch default-style
    # uniform(-1/sqrt(IN), 1/sqrt(IN)) — deterministic here via PRNGKey(0).
    w = 0.1 * jax.random.normal(k_w, (OUT, IN), dtype=jnp.float32)  # PyTorch (out, in)
    bound = 1.0 / jnp.sqrt(jnp.float32(IN))
    b = jax.random.uniform(k_b, (1, OUT), dtype=jnp.float32, minval=-bound, maxval=bound)

    out = jax.block_until_ready(net_forward(x, w.T, b))
    ref = jnp.maximum(x @ w.T + b, 0.0)
    assert out.shape == (B, OUT)
    assert jnp.allclose(out, ref, atol=1e-5, rtol=1e-5)

    # Also exercise the multi-step grid + ragged (edge-clipped) last block path.
    B2 = 37
    x2 = jax.random.normal(jax.random.PRNGKey(1), (B2, IN), dtype=jnp.float32)
    out2 = jax.block_until_ready(net_forward(x2, w.T, b))
    ref2 = jnp.maximum(x2 @ w.T + b, 0.0)
    assert out2.shape == (B2, OUT)
    assert jnp.allclose(out2, ref2, atol=1e-5, rtol=1e-5)

    print("KERNEL_OK")
</pallas_src>

<mosaic_0001>
module attributes {stable_mosaic.version = 11 : i64} {
  func.func @linear_relu_kernel(%arg0: i32, %arg1: memref<8x16xf32, #tpu.memory_space<vmem>>, %arg2: memref<16x10xf32, #tpu.memory_space<vmem>>, %arg3: memref<1x10xf32, #tpu.memory_space<vmem>>, %arg4: memref<8x10xf32, #tpu.memory_space<vmem>>) attributes {dimension_semantics = [#tpu.dimension_semantics<parallel>], iteration_bounds = array<i64: 1>, scalar_prefetch = 0 : i64, scratch_operands = 0 : i64, tpu.core_type = #tpu.core_type<tc>, window_params = [{transform_indices = @transform_0, window_bounds = array<i64: 8, 16>}, {pipeline_mode = #tpu.pipeline_mode<synchronous>, transform_indices = @transform_1, window_bounds = array<i64: 16, 10>}, {pipeline_mode = #tpu.pipeline_mode<synchronous>, transform_indices = @transform_2, window_bounds = array<i64: 1, 10>}, {transform_indices = @transform_3, window_bounds = array<i64: 8, 10>}]} {
    %c0 = arith.constant 0 : index
    %c0_0 = arith.constant 0 : index
    %0 = vector.load %arg1[%c0, %c0_0] : memref<8x16xf32, #tpu.memory_space<vmem>>, vector<8x16xf32>
    %c0_1 = arith.constant 0 : index
    %c0_2 = arith.constant 0 : index
    %1 = vector.load %arg2[%c0_1, %c0_2] : memref<16x10xf32, #tpu.memory_space<vmem>>, vector<16x10xf32>
    %cst = arith.constant dense<0.000000e+00> : vector<8x10xf32>
    %2 = tpu.matmul %0, %1, %cst {dimension_numbers = #tpu.dot_dimension_numbers<[1], [0], [0], [1], [0, 0, 1, 1], [], []>} : vector<8x16xf32>, vector<16x10xf32>, vector<8x10xf32> -> vector<8x10xf32>
    %c0_3 = arith.constant 0 : index
    %c0_4 = arith.constant 0 : index
    %3 = vector.load %arg3[%c0_3, %c0_4] : memref<1x10xf32, #tpu.memory_space<vmem>>, vector<1x10xf32>
    %4 = vector.broadcast %3 : vector<1x10xf32> to vector<8x10xf32>
    %5 = arith.addf %2, %4 : vector<8x10xf32>
    %cst_5 = arith.constant 0.000000e+00 : f32
    %6 = vector.broadcast %cst_5 : f32 to vector<8x10xf32>
    %7 = arith.maximumf %5, %6 : vector<8x10xf32>
    %c0_6 = arith.constant 0 : index
    %c0_7 = arith.constant 0 : index
    %8 = vector.load %arg4[%c0_6, %c0_7] : memref<8x10xf32, #tpu.memory_space<vmem>>, vector<8x10xf32>
    tpu.vector_store %arg4[%c0_6, %c0_7], %7 {strides = array<i32>} : memref<8x10xf32, #tpu.memory_space<vmem>>, vector<8x10xf32>,
    return
  }
  func.func @transform_0(%arg0: i32) -> (i32, i32) {
    %c0_i32 = arith.constant 0 : i32
    %c0_i32_0 = arith.constant 0 : i32
    return %arg0, %c0_i32 : i32, i32
  }
  func.func @transform_1(%arg0: i32) -> (i32, i32) {
    %c0_i32 = arith.constant 0 : i32
    %c0_i32_0 = arith.constant 0 : i32
    %c0_i32_1 = arith.constant 0 : i32
    return %c0_i32, %c0_i32_0 : i32, i32
  }
  func.func @transform_2(%arg0: i32) -> (i32, i32) {
    %c0_i32 = arith.constant 0 : i32
    %c0_i32_0 = arith.constant 0 : i32
    %c0_i32_1 = arith.constant 0 : i32
    return %c0_i32, %c0_i32_0 : i32, i32
  }
  func.func @transform_3(%arg0: i32) -> (i32, i32) {
    %c0_i32 = arith.constant 0 : i32
    %c0_i32_0 = arith.constant 0 : i32
    return %arg0, %c0_i32 : i32, i32
  }
}

</mosaic_0001>

<bundles_post_ra>
// kernel: net_forward.1
= control target key start
LH: loop header
LB: loop body
LE: loop exit
PB: predicated region body
PF: predicated region fallthrough
CT: control target
= control target key end

     0   :  { %8 = vsyncpa [#allocation3], 0  ;;  %s268_s0 = inlined_call_operand.hbm [shape: f32[8,16], index: 0, kind: input, shape index: {}]   ;;  %s269_s1 = inlined_call_operand.hbm [shape: f32[16,10], index: 1, kind: input, shape index: {}]   ;;  %s270_s2 = inlined_call_operand.vmem [shape: f32[1,10], index: 2, kind: input, shape index: {}]   ;;  %s271_s3 = inlined_call_operand.hbm [shape: f32[8,10], index: 3, kind: output, shape index: {}]  }
   0x1   :  { %9 = vsyncpa [#allocation6], 0 }
   0x2   :  { %10 = vsyncpa [#allocation4], 0  ;;  %s229_s12 = smov [#allocation2]   ;;  %s230_s14 = smov [#allocation5]  }
   0x3   :  { %s17_s13 = sshll.u32 %s229_s12, 4  ;;  %s26_s15 = sshll.u32 %s230_s14, 4  ;;  %s18_s13 = int_to_ptr.vmem [resolvable:$true] %s17_s13  ;;  %s27_s15 = int_to_ptr.vmem [resolvable:$true] %s26_s15 }
   0x4   :  { %s171_s16 = scalar_lea.vmem %s18_s13, 128  ;;  %p176_p1 = scmp.lt.s32.totalorder %s18_s13, %s18_s13 }
   0x5   :  { %p172_p0 = scmp.ne.s32.totalorder %s18_s13, %s171_s16  ;;  %p177_p2 = scmp.lt.s32.totalorder %s171_s16, %s171_s16 }
   0x7   :  { %p178_p3 = por %p177_p2, %p176_p1 }
   0x9   :  { %p179_p4 = pnand %p178_p3, %p172_p0 }
   0xb   :  { %182 = shalt.err (!%p179_p4)
}
   0xc   :  { %20 = dma.hbm_to_vmem [thread:$0]  %s268_s0, 128, %s18_s13, [#allocation3]  }
   0xd   :  { %s191_s19 = scalar_lea.vmem %s27_s15, 256  ;;  %p196_p6 = scmp.lt.s32.totalorder %s27_s15, %s27_s15 }
   0xe   :  { %p192_p5 = scmp.ne.s32.totalorder %s27_s15, %s191_s19  ;;  %p197_p7 = scmp.lt.s32.totalorder %s191_s19, %s191_s19 }
  0x10   :  { %p198_p8 = por %p197_p7, %p196_p6 }
  0x12   :  { %p199_p9 = pnand %p198_p8, %p192_p5 }
  0x14   :  { %202 = shalt.err (!%p199_p9)
}
  0x15   :  { %s231_s20 = smov 128   ;;  %s232_s21 = smov 8  }
  0x16   :  { %32 = dma.hbm_to_vmem [thread:$0]  %s269_s1, 256, %s27_s15, [#allocation6], %s231_s20, %s231_s20, %s232_s21  }
  0x17   :  { %223 = dma.done.wait [#allocation3], 128  }
  0x18   :  { %224 = vsyncadd [#allocation3], 4294967168 }
  0x19   :  { %225 = dma.done.wait [#allocation6], 256  }
  0x1a   :  { %226 = vsyncadd [#allocation6], 4294967040  ;;  %v233_v0 = vmov 0.0   ;;  %vm234_vm0 = vmmov 0   ;;  %v43_v1 = vld [vmem:[#allocation5 + $0x8] sm:$0xff]  ;;  %v42_v2 = vld [vmem:[#allocation5] sm:$0xff] }
  0x1b   :  { %149 = vmatprep.subr.mxu0 %v233_v0  ;;  %153 = vmatprep.mubr.msk.f32.mxu0 %vm234_vm0, %v233_v0  ;;  %v41_v3 = vld [vmem:[#allocation2] sm:$0xff]  ;;  %vm51_vm1 = vcmask 130048   ;;  %s235_s1 = smov [#allocation7]   ;;  %vm126_vm2 = vcmask 80896  }
  0x1c   :  { %150 = vmatpush3.msra.mxu0 %v43_v1  ;;  %v144_v4 = vld [vmem:[%s270_s2] ss:$0 sm:$0xff]  ;;  %s134_s25 = sshll.u32 %s235_s1, 4  ;;  %s135_s25 = int_to_ptr.vmem [resolvable:$true] %s134_s25 }
  0x1d   :  { %151 = vmatprep.subr.mxu0 %v233_v0  ;;  %s203_s26 = scalar_lea.vmem %s135_s25, 128  ;;  %p208_p11 = scmp.lt.s32.totalorder %s135_s25, %s135_s25 }
  0x1e   :  { %152 = vmatpush3.msra.mxu0 %v42_v2  ;;  %p204_p10 = scmp.ne.s32.totalorder %s135_s25, %s203_s26  ;;  %p209_p12 = scmp.lt.s32.totalorder %s203_s26, %s203_s26 }
  0x1f   :  { %154 = vmatmul.mubr.msk.f32.vlgmr.msra.gmra.mxu0 %vm51_vm1, %v41_v3 }
  0x20   :  { %p210_p13 = por %p209_p12, %p208_p11 }
  0x22   :  { %p211_p0 = pnand %p210_p13, %p204_p10 }
  0xdf   :  { %v121_v5 = vpop.f32.mrf.mxu0 }
  0xe0   :  { %v122_v6 = vadd.f32 %v144_v4, %v121_v5 }
  0xe1   :  { %v155_v7 = vpop.f32.mrf.mxu0 }
  0xe2   :  { %v125_v8 = vmax.f32 %v122_v6, 0.0 }
  0xe4   :  { %127 = vst.msk [vmem:[#allocation7] sm:$0xff] %vm126_vm2, %v125_v8 }
  0xe5   :  { %214 = shalt.err (!%p211_p0)
}
  0xe6   :  { %137 = dma.vmem_to_hbm [thread:$0]  %s135_s25, 128, %s271_s3, [#allocation4]  }
  0xe7   :  { %227 = dma.done.wait [#allocation4], 128  }
  0xe8   :  { %228 = vsyncadd [#allocation4], 4294967168 }
  0xe9   :  { %141 = vsyncpa [#allocation3], 1 }
  0xea   :  { %142 = vsyncpa [#allocation6], 1 }
  0xeb   :  { %143 = vsyncpa [#allocation4], 1 }

</bundles_post_ra>
